<compile_context>
chip_gen: v6e
topology: v6e:2x2x1
jax: 0.10.0
libtpu: 0.0.40
codegen_flags: <defaults>
</compile_context>

<pallas_src>
import functools

import jax
import jax.numpy as jnp
from jax.experimental import pallas as pl
from jax.experimental.pallas import tpu as pltpu

_LANE = 128


def _round_up(x, m):
    return ((x + m - 1) // m) * m


# ---------------------------------------------------------------------------
# Fused decoder kernel: chain of (x @ W + b) [+ ReLU], all in VMEM/vregs.
# refs = (z_ref, bias_ref, w0_ref, ..., w{L-1}_ref, o_ref)
# ---------------------------------------------------------------------------
def _decoder_kernel(*refs, num_layers, use_activation):
    z_ref, b_ref = refs[0], refs[1]
    w_refs = refs[2:2 + num_layers]
    o_ref = refs[-1]

    x = z_ref[...]                       # keep native dtype; no blanket f32 upcast
    b_all = b_ref[...]                   # (L, Nmax) f32, loaded once

    for li in range(num_layers):
        w = w_refs[li][...]              # (k_pad, n_pad) bf16, pre-transposed
        n_pad = w.shape[1]
        # bf16 x bf16 on the MXU, f32 accumulation.
        x = jnp.dot(x.astype(w.dtype), w, preferred_element_type=jnp.float32)
        x = x + b_all[li, :n_pad]        # bias add in f32 on the VPU
        if use_activation and li < num_layers - 1:
            x = jnp.maximum(x, 0.0)      # ReLU on hidden layers only
    o_ref[...] = x.astype(o_ref.dtype)


# ---------------------------------------------------------------------------
# Wrapper
# ---------------------------------------------------------------------------
def decoder_forward(packed, z, *, use_activation=True, tm=256):
    """Fused forward pass matching Decoder.forward.

    tm: batch-row tile.  256 fills the 256-wide MXU on v6e/v7x; use tm=128 on
    v5e (4x128^2 MXU) where a larger M tile only grows the intermediates.
    """
    weights = packed["weights"]          # list of (k_pad, n_pad) bf16 arrays
    biases = packed["biases"]            # (L, Nmax) f32
    num_layers = len(weights)
    B, K0 = z.shape
    out_dim = weights[-1].shape[1]

    tm = min(tm, B)                      # either == B (full dim) or mult. of 8
    grid = (pl.cdiv(B, tm),)

    # VMEM plan: resident weights/biases (x2 worst case if the compiler still
    # double-buffers them) + double-buffered streamed row tiles + headroom.
    resident_bytes = sum(w.size * w.dtype.itemsize for w in weights)
    resident_bytes += biases.size * biases.dtype.itemsize
    streamed_bytes = (tm * K0 + tm * out_dim) * z.dtype.itemsize
    vmem_limit = 2 * resident_bytes + 2 * 2 * streamed_bytes + (4 << 20)
    vmem_limit = int(max(16 << 20, min(vmem_limit, 64 << 20)))

    kernel = functools.partial(
        _decoder_kernel, num_layers=num_layers, use_activation=use_activation)
    operands = [z, biases] + list(weights)

    def build(buffered_resident):
        resident_kw = (
            dict(pipeline_mode=pl.Buffered(1)) if buffered_resident else {})
        in_specs = [pl.BlockSpec((tm, K0), lambda i: (i, 0)),
                    pl.BlockSpec(biases.shape, lambda i: (0, 0),
                                 **resident_kw)]
        for w in weights:
            in_specs.append(
                pl.BlockSpec(w.shape, lambda i: (0, 0), **resident_kw))
        return pl.pallas_call(
            kernel,
            out_shape=jax.ShapeDtypeStruct((B, out_dim), z.dtype),
            grid=grid,
            in_specs=in_specs,
            out_specs=pl.BlockSpec((tm, out_dim), lambda i: (i, 0)),
            compiler_params=pltpu.CompilerParams(
                # Megacore-shard batch tiles.  NOTE(v7x): this duplicates the
                # resident weights into each TensorCore's 64 MiB VMEM; for
                # weight-heavy configs prefer a single-core grid.
                dimension_semantics=("parallel",),
                vmem_limit_bytes=vmem_limit),
        )

    try:
        return build(True)(*operands)
    except Exception:
        # Fallback for jax versions where BlockSpec.pipeline_mode /
        # pl.Buffered(1) is not accepted by the pallas_call pipeliner.
        return build(False)(*operands)


# ---------------------------------------------------------------------------
# Parameter construction (weights stored pre-transposed as (in, out)).
# ---------------------------------------------------------------------------
def init_linear(key, in_dim, out_dim, dtype=jnp.float32):
    """nn.Linear-style U(-1/sqrt(fan_in), +1/sqrt(fan_in))."""
    kw, kb = jax.random.split(key)
    bound = 1.0 / (in_dim ** 0.5)
    w = jax.random.uniform(kw, (in_dim, out_dim), dtype, -bound, bound)
    b = jax.random.uniform(kb, (out_dim,), dtype, -bound, bound)
    return w, b


def make_decoder_params(key, latent_dim, input_dim, hidden_dims):
    """Matches Decoder.__init__: hidden layers over reversed(hidden_dims), then l1."""
    layers = []
    d = latent_dim
    if hidden_dims is not None:
        for h_dim in reversed(hidden_dims):
            key, sub = jax.random.split(key)
            layers.append(init_linear(sub, d, h_dim))
            d = h_dim
    key, sub = jax.random.split(key)
    layers.append(init_linear(sub, d, input_dim))   # l1 (no activation)
    return layers


def pack_decoder_params(layers, weight_dtype=jnp.bfloat16):
    """Pad hidden widths to lane-dense multiples of 128, cast weights to bf16,
    and stack all biases into one (L, Nmax) f32 operand."""
    num_layers = len(layers)
    padded_w, padded_n = [], []
    k_pad = layers[0][0].shape[0]        # input feature dim stays unpadded
    for li, (w, b) in enumerate(layers):
        k, n = w.shape
        is_last = li == num_layers - 1
        n_pad = n if is_last else _round_up(n, _LANE)
        wp = jnp.zeros((k_pad, n_pad), weight_dtype)
        wp = wp.at[:k, :n].set(w.astype(weight_dtype))
        padded_w.append(wp)
        padded_n.append(n_pad)
        k_pad = n_pad
    n_max = max(padded_n)
    b_stack = jnp.zeros((num_layers, n_max), jnp.float32)
    for li, (_, b) in enumerate(layers):
        b_stack = b_stack.at[li, :b.shape[0]].set(b.astype(jnp.float32))
    return {"weights": padded_w, "biases": b_stack}


def decoder_forward_ref(layers, z, *, use_activation=True, compute_dtype=None):
    """Plain-JAX reference.  compute_dtype=bf16 mirrors the kernel's numerics
    (bf16 matmul inputs, f32 accumulation, f32 bias/ReLU)."""
    num_layers = len(layers)
    x = z
    for li, (w, b) in enumerate(layers):
        if compute_dtype is not None:
            x = jnp.dot(x.astype(compute_dtype), w.astype(compute_dtype),
                        preferred_element_type=jnp.float32)
        else:
            x = jnp.dot(x, w)
        x = x + b.astype(jnp.float32)
        if use_activation and li < num_layers - 1:
            x = jnp.maximum(x, 0.0)
    return x


if __name__ == "__main__":
    # Shapes consistent with the module: batch=8, latent_dim=16,
    # hidden_dims=[64, 32] (applied reversed -> 32 then 64), input_dim=128.
    batch, latent_dim, input_dim = 8, 16, 128
    hidden_dims = [64, 32]

    key = jax.random.PRNGKey(0)
    key_z, key_p = jax.random.split(key)
    z = jax.random.normal(key_z, (batch, latent_dim), jnp.float32)
    layers = make_decoder_params(key_p, latent_dim, input_dim, hidden_dims)
    packed = pack_decoder_params(layers)

    out = decoder_forward(packed, z, use_activation=True)
    out = jax.block_until_ready(out)
    assert out.shape == (batch, input_dim)

    # Tight check against a reference mirroring the kernel's bf16/f32 mix.
    ref_bf16 = decoder_forward_ref(layers, z, use_activation=True,
                                   compute_dtype=jnp.bfloat16)
    assert jnp.allclose(out, ref_bf16, atol=2e-3, rtol=2e-3), \
        "mismatch vs bf16-matched reference"

    # Loose check against pure-f32 module semantics (bf16 rounding only).
    ref_f32 = decoder_forward_ref(layers, z, use_activation=True)
    assert jnp.allclose(out, ref_f32, atol=5e-2, rtol=5e-2), \
        "mismatch vs f32 reference"

    print("KERNEL_OK")
</pallas_src>

<mosaic_0001>
module attributes {stable_mosaic.version = 11 : i64} {
  func.func @_decoder_kernel(%arg0: i32, %arg1: memref<8x16xf32, #tpu.memory_space<vmem>>, %arg2: memref<3x128xf32, #tpu.memory_space<vmem>>, %arg3: memref<16x128xbf16, #tpu.memory_space<vmem>>, %arg4: memref<128x128xbf16, #tpu.memory_space<vmem>>, %arg5: memref<128x128xbf16, #tpu.memory_space<vmem>>, %arg6: memref<8x128xf32, #tpu.memory_space<vmem>>) attributes {dimension_semantics = [#tpu.dimension_semantics<parallel>], iteration_bounds = array<i64: 1>, scalar_prefetch = 0 : i64, scratch_operands = 0 : i64, tpu.core_type = #tpu.core_type<tc>, window_params = [{transform_indices = @transform_0, window_bounds = array<i64: 8, 16>}, {pipeline_mode = #tpu.pipeline_mode<synchronous>, transform_indices = @transform_1, window_bounds = array<i64: 3, 128>}, {pipeline_mode = #tpu.pipeline_mode<synchronous>, transform_indices = @transform_2, window_bounds = array<i64: 16, 128>}, {pipeline_mode = #tpu.pipeline_mode<synchronous>, transform_indices = @transform_3, window_bounds = array<i64: 128, 128>}, {pipeline_mode = #tpu.pipeline_mode<synchronous>, transform_indices = @transform_4, window_bounds = array<i64: 128, 128>}, {transform_indices = @transform_5, window_bounds = array<i64: 8, 128>}]} {
    %c0 = arith.constant 0 : index
    %c0_0 = arith.constant 0 : index
    %0 = vector.load %arg1[%c0, %c0_0] : memref<8x16xf32, #tpu.memory_space<vmem>>, vector<8x16xf32>
    %c0_1 = arith.constant 0 : index
    %c0_2 = arith.constant 0 : index
    %1 = vector.load %arg2[%c0_1, %c0_2] : memref<3x128xf32, #tpu.memory_space<vmem>>, vector<3x128xf32>
    %c0_3 = arith.constant 0 : index
    %c0_4 = arith.constant 0 : index
    %2 = vector.load %arg3[%c0_3, %c0_4] : memref<16x128xbf16, #tpu.memory_space<vmem>>, vector<16x128xbf16>
    %3 = arith.truncf %0 : vector<8x16xf32> to vector<8x16xbf16>
    %cst = arith.constant dense<0.000000e+00> : vector<8x128xf32>
    %4 = tpu.matmul %3, %2, %cst {dimension_numbers = #tpu.dot_dimension_numbers<[1], [0], [0], [1], [0, 0, 1, 1], [], []>} : vector<8x16xbf16>, vector<16x128xbf16>, vector<8x128xf32> -> vector<8x128xf32>
    %5 = vector.extract_strided_slice %1 {offsets = [0, 0], sizes = [1, 128], strides = [1, 1]} : vector<3x128xf32> to vector<1x128xf32>
    %6 = vector.shape_cast %5 : vector<1x128xf32> to vector<128xf32>
    %7 = vector.shape_cast %6 : vector<128xf32> to vector<1x128xf32>
    %8 = vector.broadcast %7 : vector<1x128xf32> to vector<8x128xf32>
    %9 = arith.addf %4, %8 : vector<8x128xf32>
    %cst_5 = arith.constant 0.000000e+00 : f32
    %10 = vector.broadcast %cst_5 : f32 to vector<8x128xf32>
    %11 = arith.maximumf %9, %10 : vector<8x128xf32>
    %c0_6 = arith.constant 0 : index
    %c0_7 = arith.constant 0 : index
    %12 = vector.load %arg4[%c0_6, %c0_7] : memref<128x128xbf16, #tpu.memory_space<vmem>>, vector<128x128xbf16>
    %13 = arith.truncf %11 : vector<8x128xf32> to vector<8x128xbf16>
    %cst_8 = arith.constant dense<0.000000e+00> : vector<8x128xf32>
    %14 = tpu.matmul %13, %12, %cst_8 {dimension_numbers = #tpu.dot_dimension_numbers<[1], [0], [0], [1], [0, 0, 1, 1], [], []>} : vector<8x128xbf16>, vector<128x128xbf16>, vector<8x128xf32> -> vector<8x128xf32>
    %15 = vector.extract_strided_slice %1 {offsets = [1, 0], sizes = [1, 128], strides = [1, 1]} : vector<3x128xf32> to vector<1x128xf32>
    %16 = vector.shape_cast %15 : vector<1x128xf32> to vector<128xf32>
    %17 = vector.shape_cast %16 : vector<128xf32> to vector<1x128xf32>
    %18 = vector.broadcast %17 : vector<1x128xf32> to vector<8x128xf32>
    %19 = arith.addf %14, %18 : vector<8x128xf32>
    %cst_9 = arith.constant 0.000000e+00 : f32
    %20 = vector.broadcast %cst_9 : f32 to vector<8x128xf32>
    %21 = arith.maximumf %19, %20 : vector<8x128xf32>
    %c0_10 = arith.constant 0 : index
    %c0_11 = arith.constant 0 : index
    %22 = vector.load %arg5[%c0_10, %c0_11] : memref<128x128xbf16, #tpu.memory_space<vmem>>, vector<128x128xbf16>
    %23 = arith.truncf %21 : vector<8x128xf32> to vector<8x128xbf16>
    %cst_12 = arith.constant dense<0.000000e+00> : vector<8x128xf32>
    %24 = tpu.matmul %23, %22, %cst_12 {dimension_numbers = #tpu.dot_dimension_numbers<[1], [0], [0], [1], [0, 0, 1, 1], [], []>} : vector<8x128xbf16>, vector<128x128xbf16>, vector<8x128xf32> -> vector<8x128xf32>
    %25 = vector.extract_strided_slice %1 {offsets = [2, 0], sizes = [1, 128], strides = [1, 1]} : vector<3x128xf32> to vector<1x128xf32>
    %26 = vector.shape_cast %25 : vector<1x128xf32> to vector<128xf32>
    %27 = vector.shape_cast %26 : vector<128xf32> to vector<1x128xf32>
    %28 = vector.broadcast %27 : vector<1x128xf32> to vector<8x128xf32>
    %29 = arith.addf %24, %28 : vector<8x128xf32>
    %c0_13 = arith.constant 0 : index
    %c0_14 = arith.constant 0 : index
    %30 = vector.load %arg6[%c0_13, %c0_14] : memref<8x128xf32, #tpu.memory_space<vmem>>, vector<8x128xf32>
    tpu.vector_store %arg6[%c0_13, %c0_14], %29 {strides = array<i32>} : memref<8x128xf32, #tpu.memory_space<vmem>>, vector<8x128xf32>,
    return
  }
  func.func @transform_0(%arg0: i32) -> (i32, i32) {
    %c0_i32 = arith.constant 0 : i32
    %c0_i32_0 = arith.constant 0 : i32
    return %arg0, %c0_i32 : i32, i32
  }
  func.func @transform_1(%arg0: i32) -> (i32, i32) {
    %c0_i32 = arith.constant 0 : i32
    %c0_i32_0 = arith.constant 0 : i32
    %c0_i32_1 = arith.constant 0 : i32
    return %c0_i32, %c0_i32_0 : i32, i32
  }
  func.func @transform_2(%arg0: i32) -> (i32, i32) {
    %c0_i32 = arith.constant 0 : i32
    %c0_i32_0 = arith.constant 0 : i32
    %c0_i32_1 = arith.constant 0 : i32
    return %c0_i32, %c0_i32_0 : i32, i32
  }
  func.func @transform_3(%arg0: i32) -> (i32, i32) {
    %c0_i32 = arith.constant 0 : i32
    %c0_i32_0 = arith.constant 0 : i32
    %c0_i32_1 = arith.constant 0 : i32
    return %c0_i32, %c0_i32_0 : i32, i32
  }
  func.func @transform_4(%arg0: i32) -> (i32, i32) {
    %c0_i32 = arith.constant 0 : i32
    %c0_i32_0 = arith.constant 0 : i32
    %c0_i32_1 = arith.constant 0 : i32
    return %c0_i32, %c0_i32_0 : i32, i32
  }
  func.func @transform_5(%arg0: i32) -> (i32, i32) {
    %c0_i32 = arith.constant 0 : i32
    %c0_i32_0 = arith.constant 0 : i32
    return %arg0, %c0_i32 : i32, i32
  }
}

module attributes {stable_mosaic.version = 11 : i64} {
  func.func @_decoder_kernel(%arg0: i32, %arg1: memref<8x16xf32, #tpu.memory_space<vmem>>, %arg2: memref<3x128xf32, #tpu.memory_space<vmem>>, %arg3: memref<16x128xbf16, #tpu.memory_space<vmem>>, %arg4: memref<128x128xbf16, #tpu.memory_space<vmem>>, %arg5: memref<128x128xbf16, #tpu.memory_space<vmem>>, %arg6: memref<8x128xf32, #tpu.memory_space<vmem>>) attributes {dimension_semantics = [#tpu.dimension_semantics<parallel>], iteration_bounds = array<i64: 1>, scalar_prefetch = 0 : i64, scratch_operands = 0 : i64, tpu.core_type = #tpu.core_type<tc>, window_params = [{transform_indices = @transform_0, window_bounds = array<i64: 8, 16>}, {pipeline_mode = #tpu.pipeline_mode<synchronous>, transform_indices = @transform_1, window_bounds = array<i64: 3, 128>}, {pipeline_mode = #tpu.pipeline_mode<synchronous>, transform_indices = @transform_2, window_bounds = array<i64: 16, 128>}, {pipeline_mode = #tpu.pipeline_mode<synchronous>, transform_indices = @transform_3, window_bounds = array<i64: 128, 128>}, {pipeline_mode = #tpu.pipeline_mode<synchronous>, transform_indices = @transform_4, window_bounds = array<i64: 128, 128>}, {transform_indices = @transform_5, window_bounds = array<i64: 8, 128>}]} {
    %c0 = arith.constant 0 : index
    %c0_0 = arith.constant 0 : index
    %0 = vector.load %arg1[%c0, %c0_0] : memref<8x16xf32, #tpu.memory_space<vmem>>, vector<8x16xf32>
    %c0_1 = arith.constant 0 : index
    %c0_2 = arith.constant 0 : index
    %1 = vector.load %arg2[%c0_1, %c0_2] : memref<3x128xf32, #tpu.memory_space<vmem>>, vector<3x128xf32>
    %c0_3 = arith.constant 0 : index
    %c0_4 = arith.constant 0 : index
    %2 = vector.load %arg3[%c0_3, %c0_4] : memref<16x128xbf16, #tpu.memory_space<vmem>>, vector<16x128xbf16>
    %3 = arith.truncf %0 : vector<8x16xf32> to vector<8x16xbf16>
    %cst = arith.constant dense<0.000000e+00> : vector<8x128xf32>
    %4 = tpu.matmul %3, %2, %cst {dimension_numbers = #tpu.dot_dimension_numbers<[1], [0], [0], [1], [0, 0, 1, 1], [], []>} : vector<8x16xbf16>, vector<16x128xbf16>, vector<8x128xf32> -> vector<8x128xf32>
    %5 = vector.extract_strided_slice %1 {offsets = [0, 0], sizes = [1, 128], strides = [1, 1]} : vector<3x128xf32> to vector<1x128xf32>
    %6 = vector.shape_cast %5 : vector<1x128xf32> to vector<128xf32>
    %7 = vector.shape_cast %6 : vector<128xf32> to vector<1x128xf32>
    %8 = vector.broadcast %7 : vector<1x128xf32> to vector<8x128xf32>
    %9 = arith.addf %4, %8 : vector<8x128xf32>
    %cst_5 = arith.constant 0.000000e+00 : f32
    %10 = vector.broadcast %cst_5 : f32 to vector<8x128xf32>
    %11 = arith.maximumf %9, %10 : vector<8x128xf32>
    %c0_6 = arith.constant 0 : index
    %c0_7 = arith.constant 0 : index
    %12 = vector.load %arg4[%c0_6, %c0_7] : memref<128x128xbf16, #tpu.memory_space<vmem>>, vector<128x128xbf16>
    %13 = arith.truncf %11 : vector<8x128xf32> to vector<8x128xbf16>
    %cst_8 = arith.constant dense<0.000000e+00> : vector<8x128xf32>
    %14 = tpu.matmul %13, %12, %cst_8 {dimension_numbers = #tpu.dot_dimension_numbers<[1], [0], [0], [1], [0, 0, 1, 1], [], []>} : vector<8x128xbf16>, vector<128x128xbf16>, vector<8x128xf32> -> vector<8x128xf32>
    %15 = vector.extract_strided_slice %1 {offsets = [1, 0], sizes = [1, 128], strides = [1, 1]} : vector<3x128xf32> to vector<1x128xf32>
    %16 = vector.shape_cast %15 : vector<1x128xf32> to vector<128xf32>
    %17 = vector.shape_cast %16 : vector<128xf32> to vector<1x128xf32>
    %18 = vector.broadcast %17 : vector<1x128xf32> to vector<8x128xf32>
    %19 = arith.addf %14, %18 : vector<8x128xf32>
    %cst_9 = arith.constant 0.000000e+00 : f32
    %20 = vector.broadcast %cst_9 : f32 to vector<8x128xf32>
    %21 = arith.maximumf %19, %20 : vector<8x128xf32>
    %c0_10 = arith.constant 0 : index
    %c0_11 = arith.constant 0 : index
    %22 = vector.load %arg5[%c0_10, %c0_11] : memref<128x128xbf16, #tpu.memory_space<vmem>>, vector<128x128xbf16>
    %23 = arith.truncf %21 : vector<8x128xf32> to vector<8x128xbf16>
    %cst_12 = arith.constant dense<0.000000e+00> : vector<8x128xf32>
    %24 = tpu.matmul %23, %22, %cst_12 {dimension_numbers = #tpu.dot_dimension_numbers<[1], [0], [0], [1], [0, 0, 1, 1], [], []>} : vector<8x128xbf16>, vector<128x128xbf16>, vector<8x128xf32> -> vector<8x128xf32>
    %25 = vector.extract_strided_slice %1 {offsets = [2, 0], sizes = [1, 128], strides = [1, 1]} : vector<3x128xf32> to vector<1x128xf32>
    %26 = vector.shape_cast %25 : vector<1x128xf32> to vector<128xf32>
    %27 = vector.shape_cast %26 : vector<128xf32> to vector<1x128xf32>
    %28 = vector.broadcast %27 : vector<1x128xf32> to vector<8x128xf32>
    %29 = arith.addf %24, %28 : vector<8x128xf32>
    %c0_13 = arith.constant 0 : index
    %c0_14 = arith.constant 0 : index
    %30 = vector.load %arg6[%c0_13, %c0_14] : memref<8x128xf32, #tpu.memory_space<vmem>>, vector<8x128xf32>
    tpu.vector_store %arg6[%c0_13, %c0_14], %29 {strides = array<i32>} : memref<8x128xf32, #tpu.memory_space<vmem>>, vector<8x128xf32>,
    return
  }
  func.func @transform_0(%arg0: i32) -> (i32, i32) {
    %c0_i32 = arith.constant 0 : i32
    %c0_i32_0 = arith.constant 0 : i32
    return %arg0, %c0_i32 : i32, i32
  }
  func.func @transform_1(%arg0: i32) -> (i32, i32) {
    %c0_i32 = arith.constant 0 : i32
    %c0_i32_0 = arith.constant 0 : i32
    %c0_i32_1 = arith.constant 0 : i32
    return %c0_i32, %c0_i32_0 : i32, i32
  }
  func.func @transform_2(%arg0: i32) -> (i32, i32) {
    %c0_i32 = arith.constant 0 : i32
    %c0_i32_0 = arith.constant 0 : i32
    %c0_i32_1 = arith.constant 0 : i32
    return %c0_i32, %c0_i32_0 : i32, i32
  }
  func.func @transform_3(%arg0: i32) -> (i32, i32) {
    %c0_i32 = arith.constant 0 : i32
    %c0_i32_0 = arith.constant 0 : i32
    %c0_i32_1 = arith.constant 0 : i32
    return %c0_i32, %c0_i32_0 : i32, i32
  }
  func.func @transform_4(%arg0: i32) -> (i32, i32) {
    %c0_i32 = arith.constant 0 : i32
    %c0_i32_0 = arith.constant 0 : i32
    %c0_i32_1 = arith.constant 0 : i32
    return %c0_i32, %c0_i32_0 : i32, i32
  }
  func.func @transform_5(%arg0: i32) -> (i32, i32) {
    %c0_i32 = arith.constant 0 : i32
    %c0_i32_0 = arith.constant 0 : i32
    return %arg0, %c0_i32 : i32, i32
  }
}

</mosaic_0001>

<bundles_post_ra>
// kernel: tpu_custom_call.1
= control target key start
LH: loop header
LB: loop body
LE: loop exit
PB: predicated region body
PF: predicated region fallthrough
CT: control target
= control target key end

     0   :  { %10 = vsyncpa [#allocation3], 0  ;;  %s709_s0 = inlined_call_operand.hbm [shape: f32[8,16], index: 0, kind: input, shape index: {}]   ;;  %s710_s1 = inlined_call_operand.hbm [shape: f32[3,128], index: 1, kind: input, shape index: {}]   ;;  %s711_s2 = inlined_call_operand.hbm [shape: bf16[16,128], index: 2, kind: input, shape index: {}]   ;;  %s712_s3 = inlined_call_operand.hbm [shape: bf16[128,128], index: 3, kind: input, shape index: {}]   ;;  %s713_s4 = inlined_call_operand.hbm [shape: bf16[128,128], index: 4, kind: input, shape index: {}]   ;;  %s714_s5 = inlined_call_operand.hbm [shape: f32[8,128], index: 5, kind: output, shape index: {}]  }
   0x1   :  { %11 = vsyncpa [#allocation6], 0 }
   0x2   :  { %12 = vsyncpa [#allocation9], 0 }
   0x3   :  { %13 = vsyncpa [#allocation4], 0  ;;  %s622_s18 = smov [#allocation5]  }
   0x4   :  { %s30_s19 = sshll.u32 %s622_s18, 4  ;;  %s31_s19 = int_to_ptr.vmem [resolvable:$true] %s30_s19 }
   0x5   :  { %s502_s20 = scalar_lea.vmem %s31_s19, 64  ;;  %p507_p1 = scmp.lt.s32.totalorder %s31_s19, %s31_s19 }
   0x6   :  { %p503_p0 = scmp.ne.s32.totalorder %s31_s19, %s502_s20  ;;  %p508_p2 = scmp.lt.s32.totalorder %s502_s20, %s502_s20 }
   0x8   :  { %p509_p3 = por %p508_p2, %p507_p1 }
   0xa   :  { %p510_p4 = pnand %p509_p3, %p503_p0 }
   0xc   :  { %513 = shalt.err (!%p510_p4)
}
   0xd   :  { %33 = dma.hbm_to_vmem [thread:$0]  %s710_s1, 64, %s31_s19, [#allocation6]  }
   0xe   :  { %s623_s23 = smov [#allocation8]   ;;  %s624_s25 = smov [#allocation2]  }
   0xf   :  { %s51_s24 = sshll.u32 %s623_s23, 4  ;;  %s20_s26 = sshll.u32 %s624_s25, 4  ;;  %s52_s24 = int_to_ptr.vmem [resolvable:$true] %s51_s24  ;;  %s21_s26 = int_to_ptr.vmem [resolvable:$true] %s20_s26 }
  0x10   :  { %s522_s27 = scalar_lea.vmem %s52_s24, 1024  ;;  %p527_p6 = scmp.lt.s32.totalorder %s52_s24, %s52_s24 }
  0x11   :  { %p523_p5 = scmp.ne.s32.totalorder %s52_s24, %s522_s27  ;;  %p528_p7 = scmp.lt.s32.totalorder %s522_s27, %s522_s27 }
  0x13   :  { %p529_p8 = por %p528_p7, %p527_p6 }
  0x15   :  { %p530_p9 = pnand %p529_p8, %p523_p5 }
  0x17   :  { %533 = shalt.err (!%p530_p9)
}
  0x18   :  { %s625_s28 = smov 64   ;;  %s626_s29 = smov 4  }
  0x19   :  { %57 = dma.hbm_to_vmem [thread:$0]  %s712_s3, 1024, %s52_s24, [#allocation9], %s625_s28, %s625_s28, %s626_s29  }
  0x1a   :  { %s542_s1 = scalar_lea.vmem %s21_s26, 128  ;;  %p547_p11 = scmp.lt.s32.totalorder %s21_s26, %s21_s26 }
  0x1b   :  { %p543_p10 = scmp.ne.s32.totalorder %s21_s26, %s542_s1  ;;  %p548_p12 = scmp.lt.s32.totalorder %s542_s1, %s542_s1 }
  0x1d   :  { %p549_p13 = por %p548_p12, %p547_p11 }
  0x1f   :  { %p550_p0 = pnand %p549_p13, %p543_p10 }
  0x21   :  { %553 = shalt.err (!%p550_p0)
}
  0x22   :  { %23 = dma.hbm_to_vmem [thread:$0]  %s709_s0, 128, %s21_s26, [#allocation3]  }
  0x23   :  { %s627_s9 = smov [#allocation7]   ;;  %s628_s11 = smov [#allocation10]  }
  0x24   :  { %s39_s10 = sshll.u32 %s627_s9, 4  ;;  %s63_s12 = sshll.u32 %s628_s11, 4  ;;  %s40_s10 = int_to_ptr.vmem [resolvable:$true] %s39_s10  ;;  %s64_s12 = int_to_ptr.vmem [resolvable:$true] %s63_s12 }
  0x25   :  { %s562_s13 = scalar_lea.vmem %s40_s10, 128  ;;  %p567_p2 = scmp.lt.s32.totalorder %s40_s10, %s40_s10 }
  0x26   :  { %p563_p1 = scmp.ne.s32.totalorder %s40_s10, %s562_s13  ;;  %p568_p3 = scmp.lt.s32.totalorder %s562_s13, %s562_s13 }
  0x28   :  { %p569_p4 = por %p568_p3, %p567_p2 }
  0x2a   :  { %p570_p5 = pnand %p569_p4, %p563_p1 }
  0x2c   :  { %573 = shalt.err (!%p570_p5)
}
  0x2d   :  { %45 = dma.hbm_to_vmem [thread:$0]  %s711_s2, 128, %s40_s10, [#allocation6], %s625_s28, %s625_s28, %s626_s29  }
  0x2e   :  { %s582_s0 = scalar_lea.vmem %s64_s12, 1024  ;;  %p587_p7 = scmp.lt.s32.totalorder %s64_s12, %s64_s12 }
  0x2f   :  { %p583_p6 = scmp.ne.s32.totalorder %s64_s12, %s582_s0  ;;  %p588_p8 = scmp.lt.s32.totalorder %s582_s0, %s582_s0 }
  0x31   :  { %p589_p9 = por %p588_p8, %p587_p7 }
  0x33   :  { %p590_p10 = pnand %p589_p9, %p583_p6 }
  0x35   :  { %593 = shalt.err (!%p590_p10)
}
  0x36   :  { %69 = dma.hbm_to_vmem [thread:$0]  %s713_s4, 1024, %s64_s12, [#allocation9], %s625_s28, %s625_s28, %s626_s29  }
  0x37   :  { %614 = dma.done.wait [#allocation3], 128  }
  0x38   :  { %615 = vsyncadd [#allocation3], 4294967168 }
  0x39   :  { %616 = dma.done.wait [#allocation6], 192  }
  0x3a   :  { %617 = vsyncadd [#allocation6], 4294967104 }
  0x3b   :  { %618 = dma.done.wait [#allocation9], 2048  }
  0x3c   :  { %619 = vsyncadd [#allocation9], 4294965248  ;;  %v629_v0 = vmov 0.0   ;;  %vm630_vm0 = vmmov 0   ;;  %v477_v1 = vld [vmem:[#allocation7] sm:$0xff]   ;;  %v86_v2 = vld [vmem:[#allocation2] sm:$0xff]  ;;  %v91_v18 = vlaneseq }
  0x3d   :  { %421 = vmatprep.subr.bf16.mxu0 %v629_v0  ;;  %423 = vmatprep.mubr.msk.bf16.mxu0 %vm630_vm0, %v629_v0  ;;  %v90_v3 = vpack.c.bf16 %v86_v2, %v86_v2  ;;  %vm101_vm1 = vcmask 130048   ;;  %v478_v4 = vld [vmem:[#allocation8 + $0x38] sm:$0xff]   ;;  %v479_v5 = vld [vmem:[#allocation8 + $0x30] sm:$0xff]   ;;  %v480_v6 = vld [vmem:[#allocation8 + $0x28] sm:$0xff]   ;;  %s631_s2 = smov [#allocation11]  }
  0x3e   :  { %427 = vmatprep.subr.bf16.mxu1 %v629_v0  ;;  %443 = vmatprep.mubr.msk.bf16.mxu1 %vm630_vm0, %v629_v0  ;;  %v481_v7 = vld [vmem:[#allocation8 + $0x20] sm:$0xff]   ;;  %v482_v8 = vld [vmem:[#allocation8 + $0x18] sm:$0xff]   ;;  %v483_v9 = vld [vmem:[#allocation8 + $0x10] sm:$0xff]   ;;  %v92_v19 = vshrl.u32 %v91_v18, 7  ;;  %s372_s4 = sshll.u32 %s631_s2, 4  ;;  %s373_s4 = int_to_ptr.vmem [resolvable:$true] %s372_s4 }
  0x3f   :  { %422 = vmatpush3.bf16.msra.mxu0 %v477_v1  ;;  %428 = vmatpush3.bf16.msra.mxu1 %v478_v4  ;;  %v484_v10 = vld [vmem:[#allocation8 + $0x8] sm:$0xff]   ;;  %v485_v11 = vld [vmem:[#allocation8] sm:$0xff]   ;;  %v486_v12 = vld [vmem:[#allocation10 + $0x38] sm:$0xff]   ;;  %s594_s17 = scalar_lea.vmem %s373_s4, 128  ;;  %p599_p12 = scmp.lt.s32.totalorder %s373_s4, %s373_s4 }
  0x40   :  { %447 = vmatprep.subr.bf16.mxu0 %v629_v0  ;;  %429 = vmatprep.subr.bf16.mxu1 %v629_v0  ;;  %v487_v13 = vld [vmem:[#allocation10 + $0x30] sm:$0xff]   ;;  %v488_v14 = vld [vmem:[#allocation10 + $0x28] sm:$0xff]   ;;  %v489_v15 = vld [vmem:[#allocation10 + $0x20] sm:$0xff]   ;;  %v93_v20 = vsub.s32 0, %v92_v19  ;;  %v165_v32 = vsub.s32 1, %v92_v19  ;;  %v275_v41 = vsub.s32 2, %v92_v19  ;;  %p595_p11 = scmp.ne.s32.totalorder %s373_s4, %s594_s17  ;;  %p600_p13 = scmp.lt.s32.totalorder %s594_s17, %s594_s17 }
  0x41   :  { %v490_v16 = vld [vmem:[#allocation10 + $0x18] sm:$0xff]   ;;  %v491_v17 = vld [vmem:[#allocation10 + $0x10] sm:$0xff]   ;;  %v492_v30 = vld [vmem:[#allocation10 + $0x8] sm:$0xff]  }
  0x42   :  { %424 = vmatmul.mubr.msk.bf16.vlgmr.msra.gmra.mxu0 %vm101_vm1, %v90_v3  ;;  %v87_v21 = vld [vmem:[#allocation5] sm:$0x7]  ;;  %v493_v31 = vld [vmem:[#allocation10] sm:$0xff]   ;;  %p601_p0 = por %p600_p13, %p599_p12 }
  0x43   :  { %463 = vmatprep.mubr.msk.bf16.mxu0 %vm630_vm0, %v629_v0  ;;  %430 = vmatpush3.bf16.msra.mxu1 %v479_v5  ;;  %v94_v22 = vrot.slane %v87_v21, %v93_v20  ;;  %v166_v33 = vrot.slane %v87_v21, %v165_v32  ;;  %v276_v42 = vrot.slane %v87_v21, %v275_v41 }
  0x44   :  { %431 = vmatprep.subr.bf16.mxu1 %v629_v0  ;;  %448 = vmatpush3.bf16.msra.mxu0 %v486_v12  ;;  %p602_p1 = pnand %p601_p0, %p595_p11 }
  0x45   :  { %449 = vmatprep.subr.bf16.mxu0 %v629_v0 }
  0x47   :  { %432 = vmatpush3.bf16.msra.mxu1 %v480_v6 }
  0x48   :  { %433 = vmatprep.subr.bf16.mxu1 %v629_v0  ;;  %450 = vmatpush3.bf16.msra.mxu0 %v487_v13 }
  0x49   :  { %451 = vmatprep.subr.bf16.mxu0 %v629_v0 }
  0x4b   :  { %434 = vmatpush3.bf16.msra.mxu1 %v481_v7 }
  0x4c   :  { %435 = vmatprep.subr.bf16.mxu1 %v629_v0  ;;  %452 = vmatpush3.bf16.msra.mxu0 %v488_v14 }
  0x4d   :  { %453 = vmatprep.subr.bf16.mxu0 %v629_v0 }
  0x4f   :  { %436 = vmatpush3.bf16.msra.mxu1 %v482_v8 }
  0x50   :  { %437 = vmatprep.subr.bf16.mxu1 %v629_v0  ;;  %454 = vmatpush3.bf16.msra.mxu0 %v489_v15 }
  0x51   :  { %455 = vmatprep.subr.bf16.mxu0 %v629_v0 }
  0x53   :  { %438 = vmatpush3.bf16.msra.mxu1 %v483_v9 }
  0x54   :  { %439 = vmatprep.subr.bf16.mxu1 %v629_v0  ;;  %456 = vmatpush3.bf16.msra.mxu0 %v490_v16 }
  0x55   :  { %457 = vmatprep.subr.bf16.mxu0 %v629_v0 }
  0x57   :  { %440 = vmatpush3.bf16.msra.mxu1 %v484_v10 }
  0x58   :  { %441 = vmatprep.subr.bf16.mxu1 %v629_v0  ;;  %458 = vmatpush3.bf16.msra.mxu0 %v491_v17 }
  0x59   :  { %459 = vmatprep.subr.bf16.mxu0 %v629_v0 }
  0x5b   :  { %442 = vmatpush3.bf16.msra.mxu1 %v485_v11 }
  0x5c   :  { %460 = vmatpush3.bf16.msra.mxu0 %v492_v30 }
  0x5d   :  { %461 = vmatprep.subr.bf16.mxu0 %v629_v0 }
  0x60   :  { %462 = vmatpush3.bf16.msra.mxu0 %v493_v31 }
 0x102   :  { %v139_v23 = vpop.f32.mrf.mxu0 }
 0x103   :  { %v140_v24 = vadd.f32 %v139_v23, %v94_v22 }
 0x104   :  { %v425_v25 = vpop.f32.mrf.mxu0 }
 0x105   :  { %v145_v26 = vmax.f32 %v140_v24, 0.0 }
 0x106   :  { %v142_v27 = vpop.f32.mrf.mxu0 }
 0x107   :  { %v162_v28 = vpack.c.bf16 %v145_v26, %v145_v26 }
 0x108   :  { %v426_v29 = vpop.f32.mrf.mxu0 }
 0x109   :  { %444 = vmatmul.mubr.bf16.vlgmr.msra.gmra.mxu1 %v162_v28 }
 0x1c9   :  { %v249_v34 = vpop.f32.mrf.mxu1 }
 0x1ca   :  { %v250_v35 = vadd.f32 %v249_v34, %v166_v33 }
 0x1cb   :  { %v445_v36 = vpop.f32.mrf.mxu1 }
 0x1cc   :  { %v255_v37 = vmax.f32 %v250_v35, 0.0 }
 0x1cd   :  { %v252_v38 = vpop.f32.mrf.mxu1 }
 0x1ce   :  { %v272_v39 = vpack.c.bf16 %v255_v37, %v255_v37 }
 0x1cf   :  { %v446_v40 = vpop.f32.mrf.mxu1 }
 0x1d0   :  { %464 = vmatmul.mubr.bf16.vlgmr.msra.gmra.mxu0 %v272_v39 }
 0x290   :  { %v359_v43 = vpop.f32.mrf.mxu0 }
 0x291   :  { %v360_v44 = vadd.f32 %v359_v43, %v276_v42 }
 0x292   :  { %v465_v45 = vpop.f32.mrf.mxu0 }
 0x293   :  { %365 = vst [vmem:[#allocation11] sm:$0xff] %v360_v44 }
 0x294   :  { %v362_v46 = vpop.f32.mrf.mxu0 }
 0x295   :  { %605 = shalt.err (!%p602_p1)
}
 0x296   :  { %375 = dma.vmem_to_hbm [thread:$0]  %s373_s4, 128, %s714_s5, [#allocation4]   ;;  %v466_v47 = vpop.f32.mrf.mxu0 }
 0x297   :  { %620 = dma.done.wait [#allocation4], 128  }
 0x298   :  { %621 = vsyncadd [#allocation4], 4294967168 }
 0x299   :  { %379 = vsyncpa [#allocation3], 1 }
 0x29a   :  { %380 = vsyncpa [#allocation6], 1 }
 0x29b   :  { %381 = vsyncpa [#allocation9], 1 }
 0x29c   :  { %382 = vsyncpa [#allocation4], 1 }

// kernel: tpu_custom_call.1
= control target key start
LH: loop header
LB: loop body
LE: loop exit
PB: predicated region body
PF: predicated region fallthrough
CT: control target
= control target key end

     0   :  { %10 = vsyncpa [#allocation3], 0  ;;  %s709_s0 = inlined_call_operand.hbm [shape: f32[8,16], index: 0, kind: input, shape index: {}]   ;;  %s710_s1 = inlined_call_operand.hbm [shape: f32[3,128], index: 1, kind: input, shape index: {}]   ;;  %s711_s2 = inlined_call_operand.hbm [shape: bf16[16,128], index: 2, kind: input, shape index: {}]   ;;  %s712_s3 = inlined_call_operand.hbm [shape: bf16[128,128], index: 3, kind: input, shape index: {}]   ;;  %s713_s4 = inlined_call_operand.hbm [shape: bf16[128,128], index: 4, kind: input, shape index: {}]   ;;  %s714_s5 = inlined_call_operand.hbm [shape: f32[8,128], index: 5, kind: output, shape index: {}]  }
   0x1   :  { %11 = vsyncpa [#allocation6], 0 }
   0x2   :  { %12 = vsyncpa [#allocation9], 0 }
   0x3   :  { %13 = vsyncpa [#allocation4], 0  ;;  %s622_s18 = smov [#allocation5]  }
   0x4   :  { %s30_s19 = sshll.u32 %s622_s18, 4  ;;  %s31_s19 = int_to_ptr.vmem [resolvable:$true] %s30_s19 }
   0x5   :  { %s502_s20 = scalar_lea.vmem %s31_s19, 64  ;;  %p507_p1 = scmp.lt.s32.totalorder %s31_s19, %s31_s19 }
   0x6   :  { %p503_p0 = scmp.ne.s32.totalorder %s31_s19, %s502_s20  ;;  %p508_p2 = scmp.lt.s32.totalorder %s502_s20, %s502_s20 }
   0x8   :  { %p509_p3 = por %p508_p2, %p507_p1 }
   0xa   :  { %p510_p4 = pnand %p509_p3, %p503_p0 }
   0xc   :  { %513 = shalt.err (!%p510_p4)
}
   0xd   :  { %33 = dma.hbm_to_vmem [thread:$0]  %s710_s1, 64, %s31_s19, [#allocation6]  }
   0xe   :  { %s623_s23 = smov [#allocation8]   ;;  %s624_s25 = smov [#allocation2]  }
   0xf   :  { %s51_s24 = sshll.u32 %s623_s23, 4  ;;  %s20_s26 = sshll.u32 %s624_s25, 4  ;;  %s52_s24 = int_to_ptr.vmem [resolvable:$true] %s51_s24  ;;  %s21_s26 = int_to_ptr.vmem [resolvable:$true] %s20_s26 }
  0x10   :  { %s522_s27 = scalar_lea.vmem %s52_s24, 1024  ;;  %p527_p6 = scmp.lt.s32.totalorder %s52_s24, %s52_s24 }
  0x11   :  { %p523_p5 = scmp.ne.s32.totalorder %s52_s24, %s522_s27  ;;  %p528_p7 = scmp.lt.s32.totalorder %s522_s27, %s522_s27 }
  0x13   :  { %p529_p8 = por %p528_p7, %p527_p6 }
  0x15   :  { %p530_p9 = pnand %p529_p8, %p523_p5 }
  0x17   :  { %533 = shalt.err (!%p530_p9)
}
  0x18   :  { %s625_s28 = smov 64   ;;  %s626_s29 = smov 4  }
  0x19   :  { %57 = dma.hbm_to_vmem [thread:$0]  %s712_s3, 1024, %s52_s24, [#allocation9], %s625_s28, %s625_s28, %s626_s29  }
  0x1a   :  { %s542_s1 = scalar_lea.vmem %s21_s26, 128  ;;  %p547_p11 = scmp.lt.s32.totalorder %s21_s26, %s21_s26 }
  0x1b   :  { %p543_p10 = scmp.ne.s32.totalorder %s21_s26, %s542_s1  ;;  %p548_p12 = scmp.lt.s32.totalorder %s542_s1, %s542_s1 }
  0x1d   :  { %p549_p13 = por %p548_p12, %p547_p11 }
  0x1f   :  { %p550_p0 = pnand %p549_p13, %p543_p10 }
  0x21   :  { %553 = shalt.err (!%p550_p0)
}
  0x22   :  { %23 = dma.hbm_to_vmem [thread:$0]  %s709_s0, 128, %s21_s26, [#allocation3]  }
  0x23   :  { %s627_s9 = smov [#allocation7]   ;;  %s628_s11 = smov [#allocation10]  }
  0x24   :  { %s39_s10 = sshll.u32 %s627_s9, 4  ;;  %s63_s12 = sshll.u32 %s628_s11, 4  ;;  %s40_s10 = int_to_ptr.vmem [resolvable:$true] %s39_s10  ;;  %s64_s12 = int_to_ptr.vmem [resolvable:$true] %s63_s12 }
  0x25   :  { %s562_s13 = scalar_lea.vmem %s40_s10, 128  ;;  %p567_p2 = scmp.lt.s32.totalorder %s40_s10, %s40_s10 }
  0x26   :  { %p563_p1 = scmp.ne.s32.totalorder %s40_s10, %s562_s13  ;;  %p568_p3 = scmp.lt.s32.totalorder %s562_s13, %s562_s13 }
  0x28   :  { %p569_p4 = por %p568_p3, %p567_p2 }
  0x2a   :  { %p570_p5 = pnand %p569_p4, %p563_p1 }
  0x2c   :  { %573 = shalt.err (!%p570_p5)
}
  0x2d   :  { %45 = dma.hbm_to_vmem [thread:$0]  %s711_s2, 128, %s40_s10, [#allocation6], %s625_s28, %s625_s28, %s626_s29  }
  0x2e   :  { %s582_s0 = scalar_lea.vmem %s64_s12, 1024  ;;  %p587_p7 = scmp.lt.s32.totalorder %s64_s12, %s64_s12 }
  0x2f   :  { %p583_p6 = scmp.ne.s32.totalorder %s64_s12, %s582_s0  ;;  %p588_p8 = scmp.lt.s32.totalorder %s582_s0, %s582_s0 }
  0x31   :  { %p589_p9 = por %p588_p8, %p587_p7 }
  0x33   :  { %p590_p10 = pnand %p589_p9, %p583_p6 }
  0x35   :  { %593 = shalt.err (!%p590_p10)
}
  0x36   :  { %69 = dma.hbm_to_vmem [thread:$0]  %s713_s4, 1024, %s64_s12, [#allocation9], %s625_s28, %s625_s28, %s626_s29  }
  0x37   :  { %614 = dma.done.wait [#allocation3], 128  }
  0x38   :  { %615 = vsyncadd [#allocation3], 4294967168 }
  0x39   :  { %616 = dma.done.wait [#allocation6], 192  }
  0x3a   :  { %617 = vsyncadd [#allocation6], 4294967104 }
  0x3b   :  { %618 = dma.done.wait [#allocation9], 2048  }
  0x3c   :  { %619 = vsyncadd [#allocation9], 4294965248  ;;  %v629_v0 = vmov 0.0   ;;  %vm630_vm0 = vmmov 0   ;;  %v477_v1 = vld [vmem:[#allocation7] sm:$0xff]   ;;  %v86_v2 = vld [vmem:[#allocation2] sm:$0xff]  ;;  %v91_v18 = vlaneseq }
  0x3d   :  { %421 = vmatprep.subr.bf16.mxu0 %v629_v0  ;;  %423 = vmatprep.mubr.msk.bf16.mxu0 %vm630_vm0, %v629_v0  ;;  %v90_v3 = vpack.c.bf16 %v86_v2, %v86_v2  ;;  %vm101_vm1 = vcmask 130048   ;;  %v478_v4 = vld [vmem:[#allocation8 + $0x38] sm:$0xff]   ;;  %v479_v5 = vld [vmem:[#allocation8 + $0x30] sm:$0xff]   ;;  %v480_v6 = vld [vmem:[#allocation8 + $0x28] sm:$0xff]   ;;  %s631_s2 = smov [#allocation11]  }
  0x3e   :  { %427 = vmatprep.subr.bf16.mxu1 %v629_v0  ;;  %443 = vmatprep.mubr.msk.bf16.mxu1 %vm630_vm0, %v629_v0  ;;  %v481_v7 = vld [vmem:[#allocation8 + $0x20] sm:$0xff]   ;;  %v482_v8 = vld [vmem:[#allocation8 + $0x18] sm:$0xff]   ;;  %v483_v9 = vld [vmem:[#allocation8 + $0x10] sm:$0xff]   ;;  %v92_v19 = vshrl.u32 %v91_v18, 7  ;;  %s372_s4 = sshll.u32 %s631_s2, 4  ;;  %s373_s4 = int_to_ptr.vmem [resolvable:$true] %s372_s4 }
  0x3f   :  { %422 = vmatpush3.bf16.msra.mxu0 %v477_v1  ;;  %428 = vmatpush3.bf16.msra.mxu1 %v478_v4  ;;  %v484_v10 = vld [vmem:[#allocation8 + $0x8] sm:$0xff]   ;;  %v485_v11 = vld [vmem:[#allocation8] sm:$0xff]   ;;  %v486_v12 = vld [vmem:[#allocation10 + $0x38] sm:$0xff]   ;;  %s594_s17 = scalar_lea.vmem %s373_s4, 128  ;;  %p599_p12 = scmp.lt.s32.totalorder %s373_s4, %s373_s4 }
  0x40   :  { %447 = vmatprep.subr.bf16.mxu0 %v629_v0  ;;  %429 = vmatprep.subr.bf16.mxu1 %v629_v0  ;;  %v487_v13 = vld [vmem:[#allocation10 + $0x30] sm:$0xff]   ;;  %v488_v14 = vld [vmem:[#allocation10 + $0x28] sm:$0xff]   ;;  %v489_v15 = vld [vmem:[#allocation10 + $0x20] sm:$0xff]   ;;  %v93_v20 = vsub.s32 0, %v92_v19  ;;  %v165_v32 = vsub.s32 1, %v92_v19  ;;  %v275_v41 = vsub.s32 2, %v92_v19  ;;  %p595_p11 = scmp.ne.s32.totalorder %s373_s4, %s594_s17  ;;  %p600_p13 = scmp.lt.s32.totalorder %s594_s17, %s594_s17 }
  0x41   :  { %v490_v16 = vld [vmem:[#allocation10 + $0x18] sm:$0xff]   ;;  %v491_v17 = vld [vmem:[#allocation10 + $0x10] sm:$0xff]   ;;  %v492_v30 = vld [vmem:[#allocation10 + $0x8] sm:$0xff]  }
  0x42   :  { %424 = vmatmul.mubr.msk.bf16.vlgmr.msra.gmra.mxu0 %vm101_vm1, %v90_v3  ;;  %v87_v21 = vld [vmem:[#allocation5] sm:$0x7]  ;;  %v493_v31 = vld [vmem:[#allocation10] sm:$0xff]   ;;  %p601_p0 = por %p600_p13, %p599_p12 }
  0x43   :  { %463 = vmatprep.mubr.msk.bf16.mxu0 %vm630_vm0, %v629_v0  ;;  %430 = vmatpush3.bf16.msra.mxu1 %v479_v5  ;;  %v94_v22 = vrot.slane %v87_v21, %v93_v20  ;;  %v166_v33 = vrot.slane %v87_v21, %v165_v32  ;;  %v276_v42 = vrot.slane %v87_v21, %v275_v41 }
  0x44   :  { %431 = vmatprep.subr.bf16.mxu1 %v629_v0  ;;  %448 = vmatpush3.bf16.msra.mxu0 %v486_v12  ;;  %p602_p1 = pnand %p601_p0, %p595_p11 }
  0x45   :  { %449 = vmatprep.subr.bf16.mxu0 %v629_v0 }
  0x47   :  { %432 = vmatpush3.bf16.msra.mxu1 %v480_v6 }
  0x48   :  { %433 = vmatprep.subr.bf16.mxu1 %v629_v0  ;;  %450 = vmatpush3.bf16.msra.mxu0 %v487_v13 }
  0x49   :  { %451 = vmatprep.subr.bf16.mxu0 %v629_v0 }
  0x4b   :  { %434 = vmatpush3.bf16.msra.mxu1 %v481_v7 }
  0x4c   :  { %435 = vmatprep.subr.bf16.mxu1 %v629_v0  ;;  %452 = vmatpush3.bf16.msra.mxu0 %v488_v14 }
  0x4d   :  { %453 = vmatprep.subr.bf16.mxu0 %v629_v0 }
  0x4f   :  { %436 = vmatpush3.bf16.msra.mxu1 %v482_v8 }
  0x50   :  { %437 = vmatprep.subr.bf16.mxu1 %v629_v0  ;;  %454 = vmatpush3.bf16.msra.mxu0 %v489_v15 }
  0x51   :  { %455 = vmatprep.subr.bf16.mxu0 %v629_v0 }
  0x53   :  { %438 = vmatpush3.bf16.msra.mxu1 %v483_v9 }
  0x54   :  { %439 = vmatprep.subr.bf16.mxu1 %v629_v0  ;;  %456 = vmatpush3.bf16.msra.mxu0 %v490_v16 }
  0x55   :  { %457 = vmatprep.subr.bf16.mxu0 %v629_v0 }
  0x57   :  { %440 = vmatpush3.bf16.msra.mxu1 %v484_v10 }
  0x58   :  { %441 = vmatprep.subr.bf16.mxu1 %v629_v0  ;;  %458 = vmatpush3.bf16.msra.mxu0 %v491_v17 }
  0x59   :  { %459 = vmatprep.subr.bf16.mxu0 %v629_v0 }
  0x5b   :  { %442 = vmatpush3.bf16.msra.mxu1 %v485_v11 }
  0x5c   :  { %460 = vmatpush3.bf16.msra.mxu0 %v492_v30 }
  0x5d   :  { %461 = vmatprep.subr.bf16.mxu0 %v629_v0 }
  0x60   :  { %462 = vmatpush3.bf16.msra.mxu0 %v493_v31 }
 0x102   :  { %v139_v23 = vpop.f32.mrf.mxu0 }
 0x103   :  { %v140_v24 = vadd.f32 %v139_v23, %v94_v22 }
 0x104   :  { %v425_v25 = vpop.f32.mrf.mxu0 }
 0x105   :  { %v145_v26 = vmax.f32 %v140_v24, 0.0 }
 0x106   :  { %v142_v27 = vpop.f32.mrf.mxu0 }
 0x107   :  { %v162_v28 = vpack.c.bf16 %v145_v26, %v145_v26 }
 0x108   :  { %v426_v29 = vpop.f32.mrf.mxu0 }
 0x109   :  { %444 = vmatmul.mubr.bf16.vlgmr.msra.gmra.mxu1 %v162_v28 }
 0x1c9   :  { %v249_v34 = vpop.f32.mrf.mxu1 }
 0x1ca   :  { %v250_v35 = vadd.f32 %v249_v34, %v166_v33 }
 0x1cb   :  { %v445_v36 = vpop.f32.mrf.mxu1 }
 0x1cc   :  { %v255_v37 = vmax.f32 %v250_v35, 0.0 }
 0x1cd   :  { %v252_v38 = vpop.f32.mrf.mxu1 }
 0x1ce   :  { %v272_v39 = vpack.c.bf16 %v255_v37, %v255_v37 }
 0x1cf   :  { %v446_v40 = vpop.f32.mrf.mxu1 }
 0x1d0   :  { %464 = vmatmul.mubr.bf16.vlgmr.msra.gmra.mxu0 %v272_v39 }
 0x290   :  { %v359_v43 = vpop.f32.mrf.mxu0 }
 0x291   :  { %v360_v44 = vadd.f32 %v359_v43, %v276_v42 }
 0x292   :  { %v465_v45 = vpop.f32.mrf.mxu0 }
 0x293   :  { %365 = vst [vmem:[#allocation11] sm:$0xff] %v360_v44 }
 0x294   :  { %v362_v46 = vpop.f32.mrf.mxu0 }
 0x295   :  { %605 = shalt.err (!%p602_p1)
}
 0x296   :  { %375 = dma.vmem_to_hbm [thread:$0]  %s373_s4, 128, %s714_s5, [#allocation4]   ;;  %v466_v47 = vpop.f32.mrf.mxu0 }
 0x297   :  { %620 = dma.done.wait [#allocation4], 128  }
 0x298   :  { %621 = vsyncadd [#allocation4], 4294967168 }
 0x299   :  { %379 = vsyncpa [#allocation3], 1 }
 0x29a   :  { %380 = vsyncpa [#allocation6], 1 }
 0x29b   :  { %381 = vsyncpa [#allocation9], 1 }
 0x29c   :  { %382 = vsyncpa [#allocation4], 1 }

</bundles_post_ra>
